<compile_context>
chip_gen: v7x
topology: tpu7x:2x2x1
jax: 0.10.0
libtpu: 0.0.40
codegen_flags: <defaults>
</compile_context>

<pallas_src>
import numpy as np
import jax
import jax.numpy as jnp
from jax.experimental import pallas as pl
from jax.experimental.pallas import tpu as pltpu


def _round_up(a, b):
    return (a + b - 1) // b * b


def _sos_kernel(dhi_ref, dlo_ref, c_ref, aid_ref, x_ref, out_ref):
    """One grid step = one (dim, block_n) column tile of x.

    dhi_ref/dlo_ref: (nq_pad, dim)   bf16 hi/lo halves of delta^T = (xa - xp)^T
    c_ref:           (1, block_n)    f32  c of the owning anchor, per column
    aid_ref:         (1, block_n)    i32  owning anchor row (-1 => not a negative)
    x_ref:           (dim, block_n)  f32  raw columns of x
    out_ref:         (8, block_n)    f32  per-core lane-wise partial sums
    """
    # Zero this core's resident accumulator block on its first tile.
    @pl.when(pl.program_id(1) == 0)
    def _():
        out_ref[...] = jnp.zeros_like(out_ref)

    x = x_ref[...]                                           # (dim, TN) f32
    # hi/lo split feeds exactly-representable bf16 operands to the MXU, so the
    # 3-pass Gram is ~f32 accurate independent of the matmul precision mode.
    x_hi = x.astype(jnp.bfloat16)
    x_lo = (x - x_hi.astype(jnp.float32)).astype(jnp.bfloat16)

    dhi = dhi_ref[...]                                       # (nq_pad, dim)
    dlo = dlo_ref[...]

    # G[a, k] = <delta_a, x_k>   (MXU, f32 accumulation)
    g = jnp.dot(dhi, x_hi, preferred_element_type=jnp.float32)
    g = g + jnp.dot(dhi, x_lo, preferred_element_type=jnp.float32)
    g = g + jnp.dot(dlo, x_hi, preferred_element_type=jnp.float32)

    nq_pad, tn = g.shape
    # One-hot row select per column: a single iota + compare against the
    # streamed per-column anchor id.  aid == -1 selects nothing, so anchor /
    # positive / out-of-range padding columns contribute exactly 0.
    row = jax.lax.broadcasted_iota(jnp.int32, (nq_pad, tn), 0)
    sel = row == aid_ref[...]                                # (nq_pad, TN)

    d = c_ref[...] - 2.0 * g                                 # d_an - d_pn on the selected row
    sq = jnp.where(sel, d * d, 0.0)

    # Fold the (at most one-hot per column) rows down to 8 sublanes with plain
    # VPU adds and accumulate lane-wise into the resident output block.
    part = sq[0:8, :]
    for j in range(1, nq_pad // 8):
        part = part + sq[j * 8:(j + 1) * 8, :]
    out_ref[...] += part


def sos_loss_pallas(x, label, *, block_n=None, num_core_splits=1):
    """SOS loss.  x: (dim, N) float array; label: length-N ints in {-1, 1, 0}.

    num_core_splits: leave at 1 on single-TensorCore chips (v5e / v6e); set 2
    on v7x so the column tiles shard across the two TensorCores.
    """
    label = np.asarray(label)
    x = jnp.asarray(x, jnp.float32)
    dim, n = x.shape

    nq = int(np.sum(label == -1))
    assert nq > 0, "need at least one anchor (label == -1)"
    S = n // nq
    assert S > 2, "each tuple needs at least one negative"
    M = (S - 2) * nq

    # Host-side label bookkeeping (same assumptions as the PyTorch code).
    idx_a = np.nonzero(label == -1)[0]
    idx_p = np.nonzero(label == 1)[0]
    idx_n = np.nonzero(label == 0)[0]
    assert len(idx_a) == nq and len(idx_p) == nq and len(idx_n) == M, \
        "label layout must match the PyTorch sos_loss assumptions"

    # ---- compact per-anchor quantities (tiny: nq columns, never (dim, M)) ----
    xa = x[:, idx_a]                                   # (dim, nq)
    xp = x[:, idx_p]                                   # (dim, nq)
    delta_t = (xa - xp).T                              # (nq, dim)
    c = jnp.sum((xa - xp) * (xa + xp), axis=0)         # (nq,) = ||xa||^2 - ||xp||^2

    nq_pad = _round_up(nq, 16)                         # bf16 sublanes + fold-by-8
    d_hi = delta_t.astype(jnp.bfloat16)
    d_lo = (delta_t - d_hi.astype(jnp.float32)).astype(jnp.bfloat16)
    pad_a = nq_pad - nq
    if pad_a:
        d_hi = jnp.pad(d_hi, ((0, pad_a), (0, 0)))
        d_lo = jnp.pad(d_lo, ((0, pad_a), (0, 0)))

    # ---- tile sizing: a few MiB of streamed working set per grid step --------
    if block_n is None:
        budget = 12 * 1024 * 1024
        per_col = (4 * dim * 2            # x tile, double buffered
                   + 4 * nq_pad * 6       # in-body (nq_pad, block_n) temporaries
                   + 4 * 8 * 2            # resident output rows
                   + (4 + 4) * 2)         # per-column c / anchor-id streams
        block_n = max(128, min(32768, (budget // per_col) // 128 * 128))
    assert block_n % 128 == 0
    block_n = min(block_n, _round_up(n, 128))

    x_nblocks = pl.cdiv(n, block_n)                    # real column blocks of x
    n_col_blocks = _round_up(x_nblocks, num_core_splits)
    tiles_per_core = n_col_blocks // num_core_splits
    width = n_col_blocks * block_n                     # padded column count

    # ---- per-column metadata: owning anchor id (-1 = masked) and its c -------
    aid_np = np.full((width,), -1, dtype=np.int32)
    aid_np[idx_n] = (np.arange(M, dtype=np.int64) // (S - 2)).astype(np.int32)
    aid = jnp.asarray(aid_np).reshape(1, width)
    # c value of the owning anchor per column (value irrelevant where aid == -1).
    c_per_col = jnp.take(c, jnp.asarray(np.maximum(aid_np, 0))).reshape(1, width)

    # ---- grid / specs ---------------------------------------------------------
    def col_map(ci, ti):
        return (0, ci * tiles_per_core + ti)

    def x_map(ci, ti):
        b = ci * tiles_per_core + ti
        if n_col_blocks != x_nblocks:
            # Core-split padding tiles re-read the last real block of x; their
            # columns all carry aid == -1, so they contribute exactly 0.
            b = jnp.minimum(b, x_nblocks - 1)
        return (0, b)

    const_map = lambda ci, ti: (0, 0)

    vmem_bytes = (2 * dim * block_n * 4            # x tile, 2 pipeline buffers
                  + 2 * 8 * block_n * 4            # output block
                  + 2 * 2 * block_n * 8            # c + aid streams
                  + 2 * 2 * nq_pad * dim * 2       # d_hi / d_lo (bf16)
                  + 6 * nq_pad * block_n * 4)      # in-body temporaries
    # Cap below v7x's 64 MiB physical VMEM per TensorCore.
    vmem_limit = int(min(48 * 1024 * 1024,
                         max(32 * 1024 * 1024, vmem_bytes + 8 * 1024 * 1024)))

    axis0 = "parallel" if num_core_splits > 1 else "arbitrary"
    # TODO(synk): on v7x, verify the leading "parallel" axis actually shards
    # across the two TensorCores (pltpu.CORE_PARALLEL / pl.core_map); the
    # per-core output blocks are already laid out for it and correctness does
    # not depend on it.

    partials = pl.pallas_call(
        _sos_kernel,
        out_shape=jax.ShapeDtypeStruct((num_core_splits * 8, block_n), jnp.float32),
        grid_spec=pltpu.PrefetchScalarGridSpec(
            num_scalar_prefetch=0,
            grid=(num_core_splits, tiles_per_core),
            in_specs=[
                pl.BlockSpec((nq_pad, dim), const_map),        # d_hi
                pl.BlockSpec((nq_pad, dim), const_map),        # d_lo
                pl.BlockSpec((1, block_n), col_map),           # c per column
                pl.BlockSpec((1, block_n), col_map),           # anchor id per column
                pl.BlockSpec((dim, block_n), x_map),           # raw x columns
            ],
            out_specs=pl.BlockSpec((8, block_n), lambda ci, ti: (ci, 0)),
        ),
        compiler_params=pltpu.CompilerParams(
            dimension_semantics=(axis0, "arbitrary"),
            vmem_limit_bytes=vmem_limit,
        ),
    )(d_hi, d_lo, c_per_col, aid, x)

    total = jnp.sum(partials)                  # tiny final reduce in XLA
    return jnp.sqrt(total) / nq


def sos_loss_ref(x, label):
    """Pure numpy reference with the exact PyTorch semantics (float64)."""
    x = np.asarray(x, np.float64)
    label = np.asarray(label)
    nq = int(np.sum(label == -1))
    S = x.shape[1] // nq
    xa = np.repeat(x[:, label == -1], S - 2, axis=1)
    xp = np.repeat(x[:, label == 1], S - 2, axis=1)
    xn = x[:, label == 0]
    d_an = np.sum((xa - xn) ** 2, axis=0)
    d_pn = np.sum((xp - xn) ** 2, axis=0)
    return np.sqrt(np.sum((d_an - d_pn) ** 2)) / nq


if __name__ == "__main__":
    key = jax.random.PRNGKey(0)
    k1, k2 = jax.random.split(key)

    # config 1: tiny SOLAR-style batch (nq=2 tuples of size S=8, dim=32)
    dim, nq, S = 32, 2, 8
    x1 = jax.random.normal(k1, (dim, nq * S), dtype=jnp.float32)
    label1 = np.tile(np.array([-1, 1] + [0] * (S - 2), dtype=np.int32), nq)
    out1 = jax.block_until_ready(sos_loss_pallas(x1, label1))
    np.testing.assert_allclose(np.asarray(out1), sos_loss_ref(np.asarray(x1), label1),
                               rtol=5e-4, atol=5e-4)

    # config 2: several column tiles plus a partial boundary tile (N=320, block_n=128)
    dim, nq, S = 32, 16, 20
    x2 = jax.random.normal(k2, (dim, nq * S), dtype=jnp.float32)
    label2 = np.tile(np.array([-1, 1] + [0] * (S - 2), dtype=np.int32), nq)
    out2 = jax.block_until_ready(sos_loss_pallas(x2, label2, block_n=128))
    np.testing.assert_allclose(np.asarray(out2), sos_loss_ref(np.asarray(x2), label2),
                               rtol=5e-4, atol=5e-4)

    # config 3: same data with a 2-way core split (per-core partial blocks and
    # the padded duplicate-tile path; serialized but correct on 1-TC chips).
    out3 = jax.block_until_ready(
        sos_loss_pallas(x2, label2, block_n=128, num_core_splits=2))
    np.testing.assert_allclose(np.asarray(out3), sos_loss_ref(np.asarray(x2), label2),
                               rtol=5e-4, atol=5e-4)

    print("KERNEL_OK")
</pallas_src>

<mosaic_0001>
module attributes {stable_mosaic.version = 11 : i64} {
  func.func @_sos_kernel(%arg0: i32, %arg1: i32, %arg2: memref<16x32xbf16, #tpu.memory_space<vmem>>, %arg3: memref<16x32xbf16, #tpu.memory_space<vmem>>, %arg4: memref<1x128xf32, #tpu.memory_space<vmem>>, %arg5: memref<1x128xi32, #tpu.memory_space<vmem>>, %arg6: memref<32x128xf32, #tpu.memory_space<vmem>>, %arg7: memref<8x128xf32, #tpu.memory_space<vmem>>) attributes {dimension_semantics = [#tpu.dimension_semantics<arbitrary>, #tpu.dimension_semantics<arbitrary>], iteration_bounds = array<i64: 1, 1>, scalar_prefetch = 0 : i64, scratch_operands = 0 : i64, tpu.core_type = #tpu.core_type<tc>, window_params = [{pipeline_mode = #tpu.pipeline_mode<synchronous>, transform_indices = @transform_0, window_bounds = array<i64: 16, 32>}, {pipeline_mode = #tpu.pipeline_mode<synchronous>, transform_indices = @transform_1, window_bounds = array<i64: 16, 32>}, {transform_indices = @transform_2, window_bounds = array<i64: 1, 128>}, {transform_indices = @transform_3, window_bounds = array<i64: 1, 128>}, {transform_indices = @transform_4, window_bounds = array<i64: 32, 128>}, {transform_indices = @transform_5, window_bounds = array<i64: 8, 128>}]} {
    %c0_i32 = arith.constant 0 : i32
    %0 = arith.cmpi eq, %arg1, %c0_i32 : i32
    %1 = arith.extui %0 : i1 to i32
    %c0_i32_0 = arith.constant 0 : i32
    %2 = arith.cmpi ne, %1, %c0_i32_0 : i32
    scf.if %2 {
      %cst_18 = arith.constant 0.000000e+00 : f32
      %33 = vector.broadcast %cst_18 : f32 to vector<8x128xf32>
      %c0_19 = arith.constant 0 : index
      %c0_20 = arith.constant 0 : index
      %34 = vector.load %arg7[%c0_19, %c0_20] : memref<8x128xf32, #tpu.memory_space<vmem>>, vector<8x128xf32>
      tpu.vector_store %arg7[%c0_19, %c0_20], %33 {strides = array<i32>} : memref<8x128xf32, #tpu.memory_space<vmem>>, vector<8x128xf32>,
    } else {
    }
    %c0 = arith.constant 0 : index
    %c0_1 = arith.constant 0 : index
    %3 = vector.load %arg6[%c0, %c0_1] : memref<32x128xf32, #tpu.memory_space<vmem>>, vector<32x128xf32>
    %4 = arith.truncf %3 : vector<32x128xf32> to vector<32x128xbf16>
    %5 = arith.extf %4 : vector<32x128xbf16> to vector<32x128xf32>
    %6 = arith.subf %3, %5 : vector<32x128xf32>
    %7 = arith.truncf %6 : vector<32x128xf32> to vector<32x128xbf16>
    %c0_2 = arith.constant 0 : index
    %c0_3 = arith.constant 0 : index
    %8 = vector.load %arg2[%c0_2, %c0_3] : memref<16x32xbf16, #tpu.memory_space<vmem>>, vector<16x32xbf16>
    %c0_4 = arith.constant 0 : index
    %c0_5 = arith.constant 0 : index
    %9 = vector.load %arg3[%c0_4, %c0_5] : memref<16x32xbf16, #tpu.memory_space<vmem>>, vector<16x32xbf16>
    %cst = arith.constant dense<0.000000e+00> : vector<16x128xf32>
    %10 = tpu.matmul %8, %4, %cst {dimension_numbers = #tpu.dot_dimension_numbers<[1], [0], [0], [1], [0, 0, 1, 1], [], []>} : vector<16x32xbf16>, vector<32x128xbf16>, vector<16x128xf32> -> vector<16x128xf32>
    %cst_6 = arith.constant dense<0.000000e+00> : vector<16x128xf32>
    %11 = tpu.matmul %8, %7, %cst_6 {dimension_numbers = #tpu.dot_dimension_numbers<[1], [0], [0], [1], [0, 0, 1, 1], [], []>} : vector<16x32xbf16>, vector<32x128xbf16>, vector<16x128xf32> -> vector<16x128xf32>
    %12 = arith.addf %10, %11 : vector<16x128xf32>
    %cst_7 = arith.constant dense<0.000000e+00> : vector<16x128xf32>
    %13 = tpu.matmul %9, %4, %cst_7 {dimension_numbers = #tpu.dot_dimension_numbers<[1], [0], [0], [1], [0, 0, 1, 1], [], []>} : vector<16x32xbf16>, vector<32x128xbf16>, vector<16x128xf32> -> vector<16x128xf32>
    %14 = arith.addf %12, %13 : vector<16x128xf32>
    %15 = tpu.iota {dimensions = array<i32: 0>} : vector<16x128xi32>
    %c0_8 = arith.constant 0 : index
    %c0_9 = arith.constant 0 : index
    %16 = vector.load %arg5[%c0_8, %c0_9] : memref<1x128xi32, #tpu.memory_space<vmem>>, vector<1x128xi32>
    %17 = vector.broadcast %16 : vector<1x128xi32> to vector<16x128xi32>
    %18 = arith.cmpi eq, %15, %17 : vector<16x128xi32>
    %c0_10 = arith.constant 0 : index
    %c0_11 = arith.constant 0 : index
    %19 = vector.load %arg4[%c0_10, %c0_11] : memref<1x128xf32, #tpu.memory_space<vmem>>, vector<1x128xf32>
    %cst_12 = arith.constant 2.000000e+00 : f32
    %20 = vector.broadcast %cst_12 : f32 to vector<16x128xf32>
    %21 = arith.mulf %20, %14 : vector<16x128xf32>
    %22 = vector.broadcast %19 : vector<1x128xf32> to vector<16x128xf32>
    %23 = arith.subf %22, %21 : vector<16x128xf32>
    %24 = arith.mulf %23, %23 : vector<16x128xf32>
    %cst_13 = arith.constant 0.000000e+00 : f32
    %25 = vector.broadcast %cst_13 : f32 to vector<16x128xf32>
    %26 = arith.select %18, %24, %25 : vector<16x128xi1>, vector<16x128xf32>
    %27 = vector.extract_strided_slice %26 {offsets = [0, 0], sizes = [8, 128], strides = [1, 1]} : vector<16x128xf32> to vector<8x128xf32>
    %28 = vector.extract_strided_slice %26 {offsets = [8, 0], sizes = [8, 128], strides = [1, 1]} : vector<16x128xf32> to vector<8x128xf32>
    %29 = arith.addf %27, %28 : vector<8x128xf32>
    %c0_14 = arith.constant 0 : index
    %c0_15 = arith.constant 0 : index
    %30 = vector.load %arg7[%c0_14, %c0_15] : memref<8x128xf32, #tpu.memory_space<vmem>>, vector<8x128xf32>
    %31 = arith.addf %30, %29 : vector<8x128xf32>
    %c0_16 = arith.constant 0 : index
    %c0_17 = arith.constant 0 : index
    %32 = vector.load %arg7[%c0_16, %c0_17] : memref<8x128xf32, #tpu.memory_space<vmem>>, vector<8x128xf32>
    tpu.vector_store %arg7[%c0_16, %c0_17], %31 {strides = array<i32>} : memref<8x128xf32, #tpu.memory_space<vmem>>, vector<8x128xf32>,
    return
  }
  func.func @transform_0(%arg0: i32, %arg1: i32) -> (i32, i32) {
    %c0_i32 = arith.constant 0 : i32
    %c0_i32_0 = arith.constant 0 : i32
    %c0_i32_1 = arith.constant 0 : i32
    return %c0_i32, %c0_i32_0 : i32, i32
  }
  func.func @transform_1(%arg0: i32, %arg1: i32) -> (i32, i32) {
    %c0_i32 = arith.constant 0 : i32
    %c0_i32_0 = arith.constant 0 : i32
    %c0_i32_1 = arith.constant 0 : i32
    return %c0_i32, %c0_i32_0 : i32, i32
  }
  func.func @transform_2(%arg0: i32, %arg1: i32) -> (i32, i32) {
    %c1_i32 = arith.constant 1 : i32
    %0 = arith.muli %arg0, %c1_i32 : i32
    %1 = arith.addi %0, %arg1 : i32
    %c0_i32 = arith.constant 0 : i32
    %c0_i32_0 = arith.constant 0 : i32
    return %c0_i32, %1 : i32, i32
  }
  func.func @transform_3(%arg0: i32, %arg1: i32) -> (i32, i32) {
    %c1_i32 = arith.constant 1 : i32
    %0 = arith.muli %arg0, %c1_i32 : i32
    %1 = arith.addi %0, %arg1 : i32
    %c0_i32 = arith.constant 0 : i32
    %c0_i32_0 = arith.constant 0 : i32
    return %c0_i32, %1 : i32, i32
  }
  func.func @transform_4(%arg0: i32, %arg1: i32) -> (i32, i32) {
    %c1_i32 = arith.constant 1 : i32
    %0 = arith.muli %arg0, %c1_i32 : i32
    %1 = arith.addi %0, %arg1 : i32
    %c0_i32 = arith.constant 0 : i32
    %c0_i32_0 = arith.constant 0 : i32
    return %c0_i32, %1 : i32, i32
  }
  func.func @transform_5(%arg0: i32, %arg1: i32) -> (i32, i32) {
    %c0_i32 = arith.constant 0 : i32
    %c0_i32_0 = arith.constant 0 : i32
    return %arg0, %c0_i32 : i32, i32
  }
}

</mosaic_0001>

<bundles_post_ra>
// kernel: tpu_custom_call.1
= control target key start
LH: loop header
LB: loop body
LE: loop exit
PB: predicated region body
PF: predicated region fallthrough
CT: control target
= control target key end

     0   :  { %v364_v3 = vmov 0.0   ;;  %vm365_vm0 = vmmov 0   ;;  %s436_s0 = inlined_call_operand.vmem [shape: bf16[16,32], index: 0, kind: input, shape index: {}]   ;;  %s437_s1 = inlined_call_operand.vmem [shape: bf16[16,32], index: 1, kind: input, shape index: {}]   ;;  %s438_s2 = inlined_call_operand.vmem [shape: f32[1,128], index: 2, kind: input, shape index: {}]   ;;  %s439_s3 = inlined_call_operand.vmem [shape: s32[1,128], index: 3, kind: input, shape index: {}]   ;;  %s440_s4 = inlined_call_operand.vmem [shape: f32[32,16], index: 4, kind: input, shape index: {}]   ;;  %s441_s5 = inlined_call_operand.hbm [shape: f32[8,128], index: 5, kind: output, shape index: {}]  }
   0x1   :  { %v72_v0 = vld [vmem:[%s440_s4] sm:$0xff]  ;;  %v73_v1 = vld [vmem:[%s440_s4 + $0x8] sm:$0xff]  ;;  %v74_v2 = vld [vmem:[%s440_s4 + $0x10] sm:$0xff]  ;;  %313 = vmatprep.subr.bf16.mxu0 %v364_v3  ;;  %317 = vmatprep.mubr.msk.bf16.mxu0 %vm365_vm0, %v364_v3 }
   0x2   :  { %v76_v4 = vpack.c.bf16 %v73_v1, %v72_v0  ;;  %v75_v5 = vld [vmem:[%s440_s4 + $0x18] sm:$0xff]  ;;  %305 = vmatprep.subr.bf16.mxu1 %v364_v3  ;;  %309 = vmatprep.mubr.msk.bf16.mxu1 %vm365_vm0, %v364_v3 }
   0x3   :  { %v77_v6 = vpack.c.bf16 %v75_v5, %v74_v2 }
   0x4   :  { %314 = vmatpush3.bf16.msra.mxu0 %v76_v4  ;;  %v78_v7 = vunpack.c.l.bf16 %v76_v4  ;;  %v79_v8 = vunpack.c.h.bf16 %v76_v4 }
   0x5   :  { %10 = vsyncpa [#allocation3], 0  ;;  %315 = vmatprep.subr.bf16.mxu0 %v364_v3  ;;  %v80_v9 = vunpack.c.l.bf16 %v77_v6  ;;  %v81_v10 = vunpack.c.h.bf16 %v77_v6  ;;  %v338_v13 = vld [vmem:[%s436_s0] sm:$0xff]   ;;  %vm97_vm1 = vcmask 261120   ;;  %v234_v22 = vlaneseq  ;;  %s366_s6 = smov [#allocation2]  }
   0x6   :  { %v82_v11 = vsub.f32 %v72_v0, %v78_v7  ;;  %v83_v12 = vsub.f32 %v73_v1, %v79_v8  ;;  %v339_v18 = vld [vmem:[%s437_s1] sm:$0xff]  }
   0x7   :  { %v84_v14 = vsub.f32 %v74_v2, %v80_v9  ;;  %v85_v15 = vsub.f32 %v75_v5, %v81_v10  ;;  %v235_v25 = vshrl.u32 %v234_v22, 7  ;;  %v295_v28 = vld [vmem:[%s438_s2] ss:$0 sm:$0xff]  ;;  %s269_s2 = sshll.u32 %s366_s6, 4  ;;  %s270_s2 = int_to_ptr.vmem [resolvable:$true] %s269_s2 }
   0x8   :  { %316 = vmatpush3.bf16.msra.mxu0 %v77_v6  ;;  %v86_v16 = vpack.c.bf16 %v83_v12, %v82_v11  ;;  %v294_v34 = vld [vmem:[%s439_s3] ss:$0 sm:$0xff]  ;;  %s340_s7 = scalar_lea.vmem %s270_s2, 128  ;;  %p345_p1 = scmp.lt.s32.totalorder %s270_s2, %s270_s2 }
   0x9   :  { %321 = vmatprep.subr.bf16.mxu0 %v364_v3  ;;  %v87_v17 = vpack.c.bf16 %v85_v15, %v84_v14  ;;  %v236_v33 = vadd.s32 8, %v235_v25  ;;  %vm242_vm2 = vcmp.eq.s32.totalorder %v235_v25, %v294_v34  ;;  %p341_p0 = scmp.ne.s32.totalorder %s270_s2, %s340_s7  ;;  %p346_p2 = scmp.lt.s32.totalorder %s340_s7, %s340_s7 }
   0xa   :  { %306 = vmatpush3.bf16.msra.mxu1 %v86_v16 }
   0xb   :  { %318 = vmatmul.mubr.msk.bf16.vlgmr.msra.gmra.mrb[0].mxu0 %vm97_vm1, %v338_v13  ;;  %307 = vmatprep.subr.bf16.mxu1 %v364_v3  ;;  %vm243_vm3 = vcmp.eq.s32.totalorder %v236_v33, %v294_v34  ;;  %p347_p3 = por %p346_p2, %p345_p1 }
   0xc   :  { %322 = vmatpush3.bf16.msra.mxu0 %v76_v4  ;;  %325 = vmatprep.mubr.msk.bf16.mxu0 %vm365_vm0, %v364_v3 }
   0xd   :  { %323 = vmatprep.subr.bf16.mxu0 %v364_v3  ;;  %p348_p4 = pnand %p347_p3, %p341_p0 }
   0xe   :  { %308 = vmatpush3.bf16.msra.mxu1 %v87_v17 }
  0x10   :  { %324 = vmatpush3.bf16.msra.mxu0 %v77_v6 }
  0x11   :  { %310 = vmatmul.mubr.msk.bf16.vlgmr.msra.gmra.mrb[0].mxu1 %vm97_vm1, %v338_v13 }
  0x17   :  { %326 = vmatmul.mubr.msk.bf16.vlgmr.msra.gmra.mrb[0].mxu0 %vm97_vm1, %v339_v18 }
  0xe4   :  { %v135_v19 = vpop.f32.mrb[0].mxu1 }
  0xe5   :  { %v311_v20 = vpop.f32.mrb[1].mxu1 }
  0xe6   :  { %v138_v21 = vpop.f32.mrb[2].mxu1 }
  0xe7   :  { %v312_v23 = vpop.f32.mrb[3].mxu1 }
  0xea   :  { %v225_v24 = vpop.f32.mrb[0].mxu0 }
  0xeb   :  { %v329_v26 = vadd.f32 %v225_v24, %v135_v19  ;;  %v327_v27 = vpop.f32.mrb[1].mxu0 }
  0xec   :  { %v228_v29 = vpop.f32.mrb[2].mxu0 }
  0xed   :  { %v245_v30 = vmul.f32 2.0, %v329_v26  ;;  %v330_v31 = vadd.f32 %v228_v29, %v138_v21  ;;  %v328_v32 = vpop.f32.mrb[3].mxu0 }
  0xef   :  { %v253_v35 = vsub.f32 %v295_v28, %v245_v30  ;;  %v246_v36 = vmul.f32 2.0, %v330_v31 }
  0xf1   :  { %v255_v37 = vmul.f32 %v253_v35, %v253_v35  ;;  %v254_v38 = vsub.f32 %v295_v28, %v246_v36 }
  0xf3   :  { %v256_v39 = vmul.f32 %v254_v38, %v254_v38  ;;  %v257_v40 = vsel %vm242_vm2, %v255_v37, 0.0 }
  0xf5   :  { %v258_v41 = vsel %vm243_vm3, %v256_v39, 0.0 }
  0xf6   :  { %v259_v42 = vadd.f32 %v258_v41, %v257_v40 }
  0xf8   :  { %262 = vst [vmem:[#allocation2] sm:$0xff] %v259_v42 }
  0xf9   :  { %351 = shalt.err (!%p348_p4)
}
  0xfa   :  { %s352_s9 = scalar_lea.hbm %s441_s5, 128 }
  0xfb   :  { %p353_p5 = scmp.ne.s32.totalorder %s441_s5, %s352_s9  ;;  %p356_p6 = scmp.lt.u32.totalorder %s352_s9, %s441_s5 }
  0xfd   :  { %p358_p7 = pnand %p356_p6, %p353_p5 }
  0xff   :  { %361 = shalt.err (!%p358_p7)
}
 0x100   :  { %272 = dma.vmem_to_hbm [thread:$0]  %s270_s2, 128, %s441_s5, [#allocation3]  }
 0x101   :  { %362 = dma.done.wait [#allocation3], 128  }
 0x102   :  { %363 = vsyncadd [#allocation3], 4294967168 }
 0x103   :  { %276 = vsyncpa [#allocation3], 1 }

</bundles_post_ra>
